<compile_context>
chip_gen: v6e
topology: v6e:2x2x1
jax: 0.10.0
libtpu: 0.0.40
codegen_flags: <defaults>
</compile_context>

<pallas_src>
import jax
import jax.numpy as jnp
from jax import lax
from jax.experimental import pallas as pl
from jax.experimental.pallas import tpu as pltpu


def _round_up(n, m):
    return ((n + m - 1) // m) * m


def mlp_kernel(x_ref, w1_ref, b1_ref, w2_ref, b2_ref, w3_ref, b3_ref, o_ref):
    # fc1 + ReLU (dropout = identity in eval mode).  x arrives f32; cast to bf16 on
    # the VPU immediately before the MXU matmul (hidden under MXU / DMA).
    x = x_ref[...].astype(w1_ref.dtype)
    h1 = jnp.dot(x, w1_ref[...], preferred_element_type=jnp.float32)
    h1 = jnp.maximum(h1 + b1_ref[...], 0.0)

    # fc2 + ReLU (dropout = identity in eval mode).
    h2 = jnp.dot(h1.astype(w2_ref.dtype), w2_ref[...],
                 preferred_element_type=jnp.float32)
    h2 = jnp.maximum(h2 + b2_ref[...], 0.0)

    # fc3: contract w3 (1, H2p) against h2's feature dim (rhs last-dim contraction,
    # same pattern as q @ k^T in flash attention) -> logits already lane-major as a
    # (1, TB) row.  b3 comes from SMEM (scalar path).  f32 accumulation.
    logits = lax.dot_general(
        w3_ref[...], h2.astype(w3_ref.dtype),
        dimension_numbers=(((1,), (1,)), ((), ())),
        preferred_element_type=jnp.float32) + b3_ref[0]

    # Lane-dense (1, TB) store: TB is a multiple of 128 -> unmasked vst, and HBM
    # writeback is 4 B/row instead of 512 B/row.
    o_ref[...] = jax.nn.sigmoid(logits)


def prepare_params(params, compute_dtype=jnp.bfloat16):
    """Pad hidden dims to multiples of 128, cast matmul weights to bf16, reshape w3
    to a (1, 2F) row and b3 to a (1,) SMEM scalar.  Zero padding is exact: padded
    h1/h2 columns are ReLU(0) = 0 and padded w3 lanes are 0."""
    F, H1 = params["w1"].shape
    H2 = params["w2"].shape[1]
    H1p, H2p = _round_up(H1, 128), _round_up(H2, 128)

    w1 = jnp.zeros((F, H1p), compute_dtype).at[:, :H1].set(
        params["w1"].astype(compute_dtype))
    b1 = jnp.zeros((1, H1p), jnp.float32).at[:, :H1].set(params["b1"])
    w2 = jnp.zeros((H1p, H2p), compute_dtype).at[:H1, :H2].set(
        params["w2"].astype(compute_dtype))
    b2 = jnp.zeros((1, H2p), jnp.float32).at[:, :H2].set(params["b2"])
    w3 = jnp.zeros((1, H2p), compute_dtype).at[:, :H2].set(
        params["w3"].reshape(1, -1).astype(compute_dtype))
    b3 = params["b3"].reshape(-1).astype(jnp.float32)   # (1,), lives in SMEM
    return dict(w1=w1, b1=b1, w2=w2, b2=b2, w3=w3, b3=b3)


def net_forward(x, params, *, block_b=2048):
    """x: (B, F) float32. Returns (B, 1) float32 sigmoid outputs."""
    B, F = x.shape
    p = prepare_params(params)
    H1p, H2p = p["w1"].shape[1], p["w2"].shape[1]

    # Batch tile: multiple of 128 (lane-dense output row).  Shrink only to keep
    # >= 4 grid steps so v7x megacore sharding has work for both TensorCores.
    TB = min(block_b, _round_up(B, 128))
    TB = max(128, (TB // 128) * 128)
    while TB > 128 and pl.cdiv(B, TB) < 4:
        TB = max(128, ((TB // 2) // 128) * 128)

    B_pad = _round_up(B, TB)
    n_blocks = B_pad // TB
    x_p = x if B_pad == B else jnp.pad(x, ((0, B_pad - B), (0, 0)))  # stays f32

    const = lambda a: pl.BlockSpec(a.shape, lambda i, _a=a: tuple(0 for _ in _a.shape))

    # Rough resident-VMEM estimate (x/out double-buffered, weights conservatively
    # counted twice, f32 intermediates); raise the scoped limit only when the
    # default would be tight.  TODO(synk): for very large F, tile H1p on a second
    # grid axis instead of keeping both weights fully VMEM-resident (v7x: 64 MiB).
    weight_bytes = sum(int(a.size) * a.dtype.itemsize
                       for a in (p["w1"], p["b1"], p["w2"], p["b2"], p["w3"]))
    vmem_need = (2 * TB * F * 4 + 2 * 8 * TB * 4 + 2 * weight_bytes
                 + TB * (H1p + H2p) * 4)
    vmem_limit = None
    if vmem_need > 24 * 1024 * 1024:
        vmem_limit = min(int(vmem_need * 1.5), 64 * 1024 * 1024)

    flops = 2 * B_pad * (F * H1p + H1p * H2p + H2p)
    bytes_accessed = int(x_p.size) * 4 + weight_bytes + B_pad * 4

    out = pl.pallas_call(
        mlp_kernel,
        out_shape=jax.ShapeDtypeStruct((1, B_pad), jnp.float32),
        grid=(n_blocks,),
        in_specs=[
            pl.BlockSpec((TB, F), lambda i: (i, 0)),               # x: pipelined f32 tiles
            const(p["w1"]), const(p["b1"]),                        # weights/biases resident
            const(p["w2"]), const(p["b2"]),
            const(p["w3"]),
            pl.BlockSpec(memory_space=pltpu.MemorySpace.SMEM),     # b3 scalar
        ],
        out_specs=pl.BlockSpec((1, TB), lambda i: (0, i)),         # compact lane-dense row
        compiler_params=pltpu.CompilerParams(
            dimension_semantics=("parallel",),                     # v7x: 2 TCs split batch
            vmem_limit_bytes=vmem_limit),
        cost_estimate=pl.CostEstimate(
            flops=flops, transcendentals=B_pad, bytes_accessed=bytes_accessed),
    )(x_p, p["w1"], p["b1"], p["w2"], p["b2"], p["w3"], p["b3"])

    return out.reshape(B_pad, 1)[:B]


def init_params(key, n_features):
    """Mimics PyTorch nn.Linear default init (U[-1/sqrt(fan_in), +1/sqrt(fan_in)]).
    Weights stored transposed as (in, out); biases as (1, out)."""
    dims = [(n_features, n_features * 3),
            (n_features * 3, n_features * 2),
            (n_features * 2, 1)]
    params = {}
    for i, (fin, fout) in enumerate(dims, start=1):
        key, kw, kb = jax.random.split(key, 3)
        bound = 1.0 / jnp.sqrt(jnp.float32(fin))
        params[f"w{i}"] = jax.random.uniform(kw, (fin, fout), jnp.float32, -bound, bound)
        params[f"b{i}"] = jax.random.uniform(kb, (1, fout), jnp.float32, -bound, bound)
    return params


def reference_forward(x, params):
    h1 = jnp.maximum(x @ params["w1"] + params["b1"], 0.0)
    h2 = jnp.maximum(h1 @ params["w2"] + params["b2"], 0.0)
    return jax.nn.sigmoid(h2 @ params["w3"] + params["b3"])


if __name__ == "__main__":
    key = jax.random.PRNGKey(0)
    n_features = 32
    batch = 512          # -> TB=128, 4 pipelined grid steps (both v7x TCs busy)

    key, kx = jax.random.split(key)
    x = jax.random.normal(kx, (batch, n_features), jnp.float32)
    params = init_params(key, n_features)

    out = net_forward(x, params, block_b=2048)
    out = jax.block_until_ready(out)

    ref = reference_forward(x, params)
    assert out.shape == (batch, 1), out.shape
    # bf16 matmul inputs (f32 accumulation) -> allow ~1e-2-level deltas vs f32 reference.
    assert jnp.allclose(out, ref, atol=2e-2, rtol=2e-2), (
        f"mismatch vs pure-JAX reference: max |diff| = {jnp.max(jnp.abs(out - ref))}")
    print("KERNEL_OK")
</pallas_src>

<mosaic_0001>
module attributes {stable_mosaic.version = 11 : i64} {
  func.func @mlp_kernel(%arg0: i32, %arg1: memref<128x32xf32, #tpu.memory_space<vmem>>, %arg2: memref<32x128xbf16, #tpu.memory_space<vmem>>, %arg3: memref<1x128xf32, #tpu.memory_space<vmem>>, %arg4: memref<128x128xbf16, #tpu.memory_space<vmem>>, %arg5: memref<1x128xf32, #tpu.memory_space<vmem>>, %arg6: memref<1x128xbf16, #tpu.memory_space<vmem>>, %arg7: memref<1xf32, #tpu.memory_space<smem>>, %arg8: memref<1x128xf32, #tpu.memory_space<vmem>>) attributes {dimension_semantics = [#tpu.dimension_semantics<parallel>], iteration_bounds = array<i64: 4>, scalar_prefetch = 0 : i64, scratch_operands = 0 : i64, tpu.core_type = #tpu.core_type<tc>, window_params = [{transform_indices = @transform_0, window_bounds = array<i64: 128, 32>}, {pipeline_mode = #tpu.pipeline_mode<synchronous>, transform_indices = @transform_1, window_bounds = array<i64: 32, 128>}, {pipeline_mode = #tpu.pipeline_mode<synchronous>, transform_indices = @transform_2, window_bounds = array<i64: 1, 128>}, {pipeline_mode = #tpu.pipeline_mode<synchronous>, transform_indices = @transform_3, window_bounds = array<i64: 128, 128>}, {pipeline_mode = #tpu.pipeline_mode<synchronous>, transform_indices = @transform_4, window_bounds = array<i64: 1, 128>}, {pipeline_mode = #tpu.pipeline_mode<synchronous>, transform_indices = @transform_5, window_bounds = array<i64: 1, 128>}, {transform_indices = @transform_6, window_bounds = array<i64: 1>}, {transform_indices = @transform_7, window_bounds = array<i64: 1, 128>}]} {
    %c0 = arith.constant 0 : index
    %c0_0 = arith.constant 0 : index
    %0 = vector.load %arg1[%c0, %c0_0] : memref<128x32xf32, #tpu.memory_space<vmem>>, vector<128x32xf32>
    %1 = arith.truncf %0 : vector<128x32xf32> to vector<128x32xbf16>
    %c0_1 = arith.constant 0 : index
    %c0_2 = arith.constant 0 : index
    %2 = vector.load %arg2[%c0_1, %c0_2] : memref<32x128xbf16, #tpu.memory_space<vmem>>, vector<32x128xbf16>
    %cst = arith.constant dense<0.000000e+00> : vector<128x128xf32>
    %3 = tpu.matmul %1, %2, %cst {dimension_numbers = #tpu.dot_dimension_numbers<[1], [0], [0], [1], [0, 0, 1, 1], [], []>} : vector<128x32xbf16>, vector<32x128xbf16>, vector<128x128xf32> -> vector<128x128xf32>
    %c0_3 = arith.constant 0 : index
    %c0_4 = arith.constant 0 : index
    %4 = vector.load %arg3[%c0_3, %c0_4] : memref<1x128xf32, #tpu.memory_space<vmem>>, vector<1x128xf32>
    %5 = vector.broadcast %4 : vector<1x128xf32> to vector<128x128xf32>
    %6 = arith.addf %3, %5 : vector<128x128xf32>
    %cst_5 = arith.constant 0.000000e+00 : f32
    %7 = vector.broadcast %cst_5 : f32 to vector<128x128xf32>
    %8 = arith.maximumf %6, %7 : vector<128x128xf32>
    %9 = arith.truncf %8 : vector<128x128xf32> to vector<128x128xbf16>
    %c0_6 = arith.constant 0 : index
    %c0_7 = arith.constant 0 : index
    %10 = vector.load %arg4[%c0_6, %c0_7] : memref<128x128xbf16, #tpu.memory_space<vmem>>, vector<128x128xbf16>
    %cst_8 = arith.constant dense<0.000000e+00> : vector<128x128xf32>
    %11 = tpu.matmul %9, %10, %cst_8 {dimension_numbers = #tpu.dot_dimension_numbers<[1], [0], [0], [1], [0, 0, 1, 1], [], []>} : vector<128x128xbf16>, vector<128x128xbf16>, vector<128x128xf32> -> vector<128x128xf32>
    %c0_9 = arith.constant 0 : index
    %c0_10 = arith.constant 0 : index
    %12 = vector.load %arg5[%c0_9, %c0_10] : memref<1x128xf32, #tpu.memory_space<vmem>>, vector<1x128xf32>
    %13 = vector.broadcast %12 : vector<1x128xf32> to vector<128x128xf32>
    %14 = arith.addf %11, %13 : vector<128x128xf32>
    %cst_11 = arith.constant 0.000000e+00 : f32
    %15 = vector.broadcast %cst_11 : f32 to vector<128x128xf32>
    %16 = arith.maximumf %14, %15 : vector<128x128xf32>
    %c0_12 = arith.constant 0 : index
    %c0_13 = arith.constant 0 : index
    %17 = vector.load %arg6[%c0_12, %c0_13] : memref<1x128xbf16, #tpu.memory_space<vmem>>, vector<1x128xbf16>
    %18 = arith.truncf %16 : vector<128x128xf32> to vector<128x128xbf16>
    %cst_14 = arith.constant dense<0.000000e+00> : vector<1x128xf32>
    %19 = tpu.matmul %17, %18, %cst_14 {dimension_numbers = #tpu.dot_dimension_numbers<[1], [1], [0], [0], [0, 0, 1, 0], [], []>} : vector<1x128xbf16>, vector<128x128xbf16>, vector<1x128xf32> -> vector<1x128xf32>
    %c0_15 = arith.constant 0 : index
    %20 = memref.load %arg7[%c0_15] : memref<1xf32, #tpu.memory_space<smem>>
    %21 = vector.broadcast %20 : f32 to vector<1x128xf32>
    %22 = arith.addf %19, %21 : vector<1x128xf32>
    %23 = arith.negf %22 : vector<1x128xf32>
    %24 = math.exp %23 : vector<1x128xf32>
    %cst_16 = arith.constant 1.000000e+00 : f32
    %25 = vector.broadcast %cst_16 : f32 to vector<1x128xf32>
    %26 = arith.addf %25, %24 : vector<1x128xf32>
    %27 = arith.divf %25, %26 : vector<1x128xf32>
    %c0_17 = arith.constant 0 : index
    %c0_18 = arith.constant 0 : index
    %28 = vector.load %arg8[%c0_17, %c0_18] : memref<1x128xf32, #tpu.memory_space<vmem>>, vector<1x128xf32>
    tpu.vector_store %arg8[%c0_17, %c0_18], %27 {strides = array<i32>} : memref<1x128xf32, #tpu.memory_space<vmem>>, vector<1x128xf32>,
    return
  }
  func.func @transform_0(%arg0: i32) -> (i32, i32) {
    %c0_i32 = arith.constant 0 : i32
    %c0_i32_0 = arith.constant 0 : i32
    return %arg0, %c0_i32 : i32, i32
  }
  func.func @transform_1(%arg0: i32) -> (i32, i32) {
    %c0_i32 = arith.constant 0 : i32
    %c0_i32_0 = arith.constant 0 : i32
    %c0_i32_1 = arith.constant 0 : i32
    return %c0_i32, %c0_i32_0 : i32, i32
  }
  func.func @transform_2(%arg0: i32) -> (i32, i32) {
    %c0_i32 = arith.constant 0 : i32
    %c0_i32_0 = arith.constant 0 : i32
    %c0_i32_1 = arith.constant 0 : i32
    return %c0_i32, %c0_i32_0 : i32, i32
  }
  func.func @transform_3(%arg0: i32) -> (i32, i32) {
    %c0_i32 = arith.constant 0 : i32
    %c0_i32_0 = arith.constant 0 : i32
    %c0_i32_1 = arith.constant 0 : i32
    return %c0_i32, %c0_i32_0 : i32, i32
  }
  func.func @transform_4(%arg0: i32) -> (i32, i32) {
    %c0_i32 = arith.constant 0 : i32
    %c0_i32_0 = arith.constant 0 : i32
    %c0_i32_1 = arith.constant 0 : i32
    return %c0_i32, %c0_i32_0 : i32, i32
  }
  func.func @transform_5(%arg0: i32) -> (i32, i32) {
    %c0_i32 = arith.constant 0 : i32
    %c0_i32_0 = arith.constant 0 : i32
    %c0_i32_1 = arith.constant 0 : i32
    return %c0_i32, %c0_i32_0 : i32, i32
  }
  func.func @transform_6(%arg0: i32) -> i32 {
    %c0_i32 = arith.constant 0 : i32
    %c0_i32_0 = arith.constant 0 : i32
    return %c0_i32 : i32
  }
  func.func @transform_7(%arg0: i32) -> (i32, i32) {
    %c0_i32 = arith.constant 0 : i32
    %c0_i32_0 = arith.constant 0 : i32
    return %c0_i32, %arg0 : i32, i32
  }
}

</mosaic_0001>

<bundles_post_ra>
// kernel: tpu_custom_call.1
= control target key start
LH: loop header
LB: loop body
LE: loop exit
PB: predicated region body
PF: predicated region fallthrough
CT: control target
= control target key end

     0   :  { %s1249_s0 = inlined_call_operand.vmem [shape: f32[512,32], index: 0, kind: input, shape index: {}]   ;;  %s1250_s1 = inlined_call_operand.vmem [shape: bf16[32,128], index: 1, kind: input, shape index: {}]   ;;  %s1251_s2 = inlined_call_operand.vmem [shape: f32[1,128], index: 2, kind: input, shape index: {}]   ;;  %s1252_s3 = inlined_call_operand.vmem [shape: bf16[128,128], index: 3, kind: input, shape index: {}]   ;;  %s1253_s4 = inlined_call_operand.vmem [shape: f32[1,128], index: 4, kind: input, shape index: {}]   ;;  %s1254_s5 = inlined_call_operand.vmem [shape: bf16[1,128], index: 5, kind: input, shape index: {}]   ;;  %s1255_s6 = inlined_call_operand.<no memory space> [shape: f32[1], index: 6, kind: input, shape index: {}]   ;;  %s1256_s7 = inlined_call_operand.hbm [shape: f32[1,512], index: 7, kind: output, shape index: {}]  }
   0x1   :  { %12 = sst [smem:[#allocation2]] %s1255_s6 }
   0x2   :  { %13 = vsyncpa [#allocation4], 0 }
   0x3   :  { %15 = vsyncpa [#allocation4 + $0x1], 0  ;;  %s1083_s26 = smov 0   ;;  %s1085_s27 = smov 0  }
   0x4   :  { %s1087_s28 = smov 0   ;;  %s1089_s29 = smov 0  }
   0x5 LB: > { %s782_s6 = sadd.s32 4294967295, %s1035_s29   ;;  %s783_s30 = sadd.s32 4294967294, %s1035_s29   ;;  %s1035_s29 = sphi %s1089_s29, %s1262_s29   ;;  %s1031_s28 = sphi %s1087_s28, %s1261_s28   ;;  %s1027_s27 = sphi %s1085_s27, %s1260_s27   ;;  %s1023_s26 = sphi %s1083_s26, %s1259_s26  }
   0x6   : > { %s1106_s8 = sadd.s32 1, %s1035_s29   ;;  %s180_s9 = sadd.s32 1, %s1031_s28 }
   0x7   : > { %s177_s10 = ssub.s32 %s1035_s29, %s1106_s8  ;;  %p190_p0 = scmp.ne.s32.totalorder %s1031_s28, %s1027_s27 }
   0x8   : > { %p178_p1 = scmp.eq.s32.totalorder %s177_s10, 0  ;;  %p191_p2 = scmp.eq.s32.totalorder %s782_s6, 3 }
   0x9   : > { %p196_p3 = scmp.ne.s32.totalorder %s1027_s27, %s1023_s26  ;;  %p197_p4 = scmp.eq.s32.totalorder %s783_s30, 3 }
   0xa   : > { %s1116_s11 = scalar_select %p178_p1, %s1031_s28, %s180_s9  }
   0xb   : > { %p1118_p5 = por %p191_p2, %p190_p0  ;;  %p1122_p6 = por %p197_p4, %p196_p3 }
   0xc   : > { %p786_p7 = scmp.ge.s32.totalorder %s1035_s29, 1  ;;  %p242_p8 = scmp.lt.s32.totalorder %s1035_s29, 5 }
   0xe   : > { %p243_p9 = pnand %p786_p7, %p242_p8 }
   0xf   : > { %s1131_s16 = sshll.u32 (!%p243_p9), %s782_s6, 4  ;;  %s666_s15 = sld [smem:[#allocation2]] (!%p243_p9) }
  0x10   : > { %246 = sbr.rel (%p243_p9) target bundleno = 766 (0x2fe), region = 48  ;;  %p274_p10 = scmp.lt.s32.totalorder (!%p243_p9), %s1131_s16, 63 }
  0x11   : > { %s271_s17 = sand.u32 (!%p243_p9), 1, %s1027_s27  }
  0x12   : > { %s272_s18 = scalar_lea.vmem (!%p243_p9), [#allocation3], %s271_s17  ;;  %s716_s23 = scalar_lea.sflag (!%p243_p9), [#allocation4], %s271_s17 }
  0x15   : > { %v961_v0 = vld [vmem:[%s1250_s1 + $0x8] sm:$0xff]   ;;  %v962_v1 = vld [vmem:[%s1250_s1] sm:$0xff]   ;;  %s275_s19 = scalar_select %p274_p10, %s1131_s16, 63  ;;  %v963_v2 = vld [vmem:[%s1252_s3 + $0x38] sm:$0xff]   ;;  %vm327_vm0 = vcmask 261120   ;;  %vm1038_vm1 = vmmov 0  }
  0x16   : > { %848 = vmatprep.subr.bf16.mxu1 %v961_v0  ;;  %v964_v12 = vld [vmem:[%s1252_s3 + $0x30] sm:$0xff]   ;;  %v965_v16 = vld [vmem:[%s1252_s3 + $0x28] sm:$0xff]   ;;  %v966_v20 = vld [vmem:[%s1252_s3 + $0x20] sm:$0xff]  }
  0x17   : > { %849 = vmatpush3.bf16.msra.mxu1 %v961_v0  ;;  %s788_s22 = sshll.u32 %s275_s19, 3  ;;  %v967_v25 = vld [vmem:[%s1252_s3 + $0x18] sm:$0xff]   ;;  %v968_v31 = vld [vmem:[%s1252_s3 + $0x10] sm:$0xff]   ;;  %v969_v32 = vld [vmem:[%s1252_s3 + $0x8] sm:$0xff]   ;;  %s728_s19 = sshll.u32 %s272_s18, 4  ;;  %s729_s19 = int_to_ptr.vmem [resolvable:$true] %s728_s19 }
  0x18   : > { %850 = vmatprep.subr.bf16.mxu1 %v962_v1  ;;  %s1144_s25 = scalar_lea.vmem %s1249_s0, %s788_s22  ;;  %v970_v33 = vld [vmem:[%s1252_s3] sm:$0xff]   ;;  %s1214_s22 = scalar_lea.hbm %s1256_s7, %s1131_s16 }
  0x19   : > { %v280_v3 = vld [vmem:[%s1144_s25] sm:$0xff]  ;;  %v281_v4 = vld [vmem:[%s1144_s25 + $0x8] sm:$0xff]  ;;  %v282_v5 = vld [vmem:[%s1144_s25 + $0x10] sm:$0xff]  ;;  %s975_s24 = scalar_lea.vmem %s729_s19, 16 }
  0x1a   : > { %v296_v6 = vpack.c.bf16 %v281_v4, %v280_v3  ;;  %v283_v7 = vld [vmem:[%s1144_s25 + $0x18] sm:$0xff]  ;;  %v284_v8 = vld [vmem:[%s1144_s25 + $0x20] sm:$0xff]  ;;  %v285_v9 = vld [vmem:[%s1144_s25 + $0x28] sm:$0xff]  ;;  %p976_p11 = scmp.ne.s32.totalorder %s729_s19, %s975_s24 }
  0x1b   : > { %851 = vmatpush3.bf16.msra.mxu1 %v962_v1  ;;  %v297_v10 = vpack.c.bf16 %v283_v7, %v282_v5  ;;  %v298_v11 = vpack.c.bf16 %v285_v9, %v284_v8  ;;  %v286_v13 = vld [vmem:[%s1144_s25 + $0x30] sm:$0xff]  ;;  %v287_v14 = vld [vmem:[%s1144_s25 + $0x38] sm:$0xff]  ;;  %v288_v15 = vld [vmem:[%s1144_s25 + $0x40] sm:$0xff] }
  0x1c   : > { %868 = vmatprep.subr.bf16.mxu1 %v963_v2  ;;  %852 = vmatprep.mubr.msk.bf16.mxu1 %vm327_vm0, %v296_v6  ;;  %v289_v17 = vld [vmem:[%s1144_s25 + $0x48] sm:$0xff]  ;;  %v299_v18 = vpack.c.bf16 %v287_v14, %v286_v13  ;;  %v290_v21 = vld [vmem:[%s1144_s25 + $0x50] sm:$0xff]  ;;  %v291_v22 = vld [vmem:[%s1144_s25 + $0x58] sm:$0xff]  ;;  %p977_p12 = pnand %p976_p11, %p1118_p5 }
  0x1d   : > { %v300_v19 = vpack.c.bf16 %v289_v17, %v288_v15  ;;  %v292_v23 = vld [vmem:[%s1144_s25 + $0x60] sm:$0xff]  ;;  %v293_v24 = vld [vmem:[%s1144_s25 + $0x68] sm:$0xff]  ;;  %v301_v26 = vpack.c.bf16 %v291_v22, %v290_v21  ;;  %v294_v28 = vld [vmem:[%s1144_s25 + $0x70] sm:$0xff] }
  0x1e   : > { %853 = vmatmul.mubr.msk.bf16.vlgmr.msra.gmra.mxu1 %vm327_vm0, %v297_v10  ;;  %v302_v27 = vpack.c.bf16 %v293_v24, %v292_v23  ;;  %v295_v29 = vld [vmem:[%s1144_s25 + $0x78] sm:$0xff]  ;;  %v789_v36 = vld [vmem:[%s1251_s2] ss:$0 sm:$0xff]  ;;  %p978_p13 = pneg %p977_p12  ;;  %s1039_s25 = smov [#allocation3]  }
  0x1f   : > { %856 = vmatprep.mubr.msk.bf16.mxu1 %vm327_vm0, %v298_v11  ;;  %869 = vmatpush3.bf16.msra.mxu1 %v963_v2  ;;  %v303_v30 = vpack.c.bf16 %v295_v29, %v294_v28  ;;  %v800_v29 = vld [vmem:[%s1253_s4] ss:$0 sm:$0xff]  ;;  %s979_s6 = sshll.u32 %s1039_s25, 4  ;;  %s980_s6 = int_to_ptr.vmem [resolvable:$false] %s979_s6 }
  0x20   : > { %870 = vmatprep.subr.bf16.mxu1 %v964_v12  ;;  %s981_s30 = scalar_lea.vmem %s980_s6, 32  ;;  %p982_p0 = scmp.lt.s32.totalorder %s729_s19, %s980_s6 }
  0x21   : > { %p983_p1 = scmp.lt.s32.totalorder %s981_s30, %s975_s24 }
  0x23   : > { %871 = vmatpush3.bf16.msra.mxu1 %v964_v12  ;;  %p984_p2 = por %p983_p1, %p982_p0 }
  0x24   : > { %872 = vmatprep.subr.bf16.mxu1 %v965_v16 }
  0x25   : > { %p985_p3 = pnand %p984_p2, %p978_p13 }
  0x26   : > { %857 = vmatmul.mubr.msk.bf16.gmra.mxu1 %vm327_vm0, %v299_v18 }
  0x27   : > { %860 = vmatprep.mubr.msk.bf16.mxu1 %vm327_vm0, %v300_v19  ;;  %873 = vmatpush3.bf16.msra.mxu1 %v965_v16 }
  0x28   : > { %874 = vmatprep.subr.bf16.mxu1 %v966_v20 }
  0x2b   : > { %875 = vmatpush3.bf16.msra.mxu1 %v966_v20 }
  0x2c   : > { %876 = vmatprep.subr.bf16.mxu1 %v967_v25 }
  0x2e   : > { %861 = vmatmul.mubr.msk.bf16.gmra.mxu1 %vm327_vm0, %v301_v26 }
  0x2f   : > { %864 = vmatprep.mubr.msk.bf16.mxu1 %vm327_vm0, %v302_v27  ;;  %877 = vmatpush3.bf16.msra.mxu1 %v967_v25  ;;  %v1037_v27 = vmov 0.0  }
  0x30   : > { %878 = vmatprep.subr.bf16.mxu1 %v968_v31  ;;  %900 = vmatprep.subr.bf16.mxu0 %v1037_v27 }
  0x31   : > { %916 = vmatprep.mubr.msk.bf16.mxu0 %vm1038_vm1, %v1037_v27 }
  0x33   : > { %879 = vmatpush3.bf16.msra.mxu1 %v968_v31 }
  0x34   : > { %880 = vmatprep.subr.bf16.mxu1 %v969_v32 }
  0x36   : > { %865 = vmatmul.mubr.msk.bf16.gmra.mxu1 %vm327_vm0, %v303_v30 }
  0x37   : > { %881 = vmatpush3.bf16.msra.mxu1 %v969_v32 }
  0x38   : > { %882 = vmatprep.subr.bf16.mxu1 %v970_v33 }
  0x3b   : > { %883 = vmatpush3.bf16.msra.mxu1 %v970_v33 }
  0xde   : > { %v854_v34 = vpop.f32.mrf.mxu1 }
  0xdf   : > { %v395_v40 = vadd.f32 %v854_v34, %v789_v36 }
  0xe0   : > { %v386_v35 = vpop.f32.mrf.mxu1 }
  0xe1   : > { %v387_v38 = vadd.f32 %v789_v36, %v386_v35  ;;  %v451_v47 = vmax.f32 %v395_v40, 0.0 }
  0xe2   : > { %v855_v37 = vpop.f32.mrf.mxu1 }
  0xe3   : > { %v398_v39 = vadd.f32 %v855_v37, %v789_v36  ;;  %v449_v45 = vmax.f32 %v387_v38, 0.0 }
  0xe4   : > { %v389_v41 = vpop.f32.mrf.mxu1 }
  0xe5   : > { %v390_v42 = vadd.f32 %v789_v36, %v389_v41  ;;  %v452_v43 = vmax.f32 %v398_v39, 0.0 }
  0xe6   : > { %v858_v44 = vpop.f32.mrf.mxu1 }
  0xe7   : > { %v450_v46 = vmax.f32 %v390_v42, 0.0  ;;  %v466_v50 = vpack.c.bf16 %v452_v43, %v451_v47  ;;  %v411_v54 = vadd.f32 %v858_v44, %v789_v36 }
  0xe8   : > { %v402_v48 = vpop.f32.mrf.mxu1 }
  0xe9   : > { %v465_v49 = vpack.c.bf16 %v450_v46, %v449_v45  ;;  %v403_v52 = vadd.f32 %v789_v36, %v402_v48  ;;  %v455_v61 = vmax.f32 %v411_v54, 0.0 }
  0xea   : > { %v859_v51 = vpop.f32.mrf.mxu1 }
  0xeb   : > { %v414_v53 = vadd.f32 %v859_v51, %v789_v36  ;;  %884 = vmatprep.mubr.bf16.mxu1 %v465_v49  ;;  %v453_v59 = vmax.f32 %v403_v52, 0.0 }
  0xec   : > { %v405_v55 = vpop.f32.mrf.mxu1  ;;  %885 = vmatmul.mubr.bf16.vlgmr.msra.gmra.mxu1 %v466_v50 }
  0xed   : > { %v406_v56 = vadd.f32 %v789_v36, %v405_v55  ;;  %v456_v57 = vmax.f32 %v414_v53, 0.0 }
  0xee   : > { %v862_v58 = vpop.f32.mrf.mxu1 }
  0xef   : > { %v454_v60 = vmax.f32 %v406_v56, 0.0  ;;  %v468_v0 = vpack.c.bf16 %v456_v57, %v455_v61  ;;  %v427_v4 = vadd.f32 %v862_v58, %v789_v36 }
  0xf0   : > { %v418_v62 = vpop.f32.mrf.mxu1 }
  0xf1   : > { %v467_v63 = vpack.c.bf16 %v454_v60, %v453_v59  ;;  %v419_v2 = vadd.f32 %v789_v36, %v418_v62  ;;  %v459_v11 = vmax.f32 %v427_v4, 0.0 }
  0xf2   : > { %v863_v1 = vpop.f32.mrf.mxu1 }
  0xf3   : > { %v430_v3 = vadd.f32 %v863_v1, %v789_v36  ;;  %888 = vmatprep.mubr.bf16.mxu1 %v467_v63  ;;  %v457_v9 = vmax.f32 %v419_v2, 0.0 }
  0xf4   : > { %v421_v5 = vpop.f32.mrf.mxu1  ;;  %889 = vmatmul.mubr.bf16.gmra.mxu1 %v468_v0 }
  0xf5   : > { %v422_v6 = vadd.f32 %v789_v36, %v421_v5  ;;  %v460_v7 = vmax.f32 %v430_v3, 0.0 }
  0xf6   : > { %v866_v8 = vpop.f32.mrf.mxu1 }
  0xf7   : > { %v458_v10 = vmax.f32 %v422_v6, 0.0  ;;  %v470_v14 = vpack.c.bf16 %v460_v7, %v459_v11  ;;  %v443_v18 = vadd.f32 %v866_v8, %v789_v36 }
  0xf8   : > { %v434_v12 = vpop.f32.mrf.mxu1 }
  0xf9   : > { %v469_v13 = vpack.c.bf16 %v458_v10, %v457_v9  ;;  %v435_v16 = vadd.f32 %v789_v36, %v434_v12  ;;  %v463_v24 = vmax.f32 %v443_v18, 0.0 }
  0xfa   : > { %v867_v15 = vpop.f32.mrf.mxu1 }
  0xfb   : > { %v446_v17 = vadd.f32 %v867_v15, %v789_v36  ;;  %892 = vmatprep.mubr.bf16.mxu1 %v469_v13  ;;  %v461_v22 = vmax.f32 %v435_v16, 0.0 }
  0xfc   : > { %v437_v19 = vpop.f32.mrf.mxu1  ;;  %893 = vmatmul.mubr.bf16.gmra.mxu1 %v470_v14 }
  0xfd   : > { %v438_v20 = vadd.f32 %v789_v36, %v437_v19  ;;  %v464_v21 = vmax.f32 %v446_v17, 0.0 }
  0xff   : > { %v462_v23 = vmax.f32 %v438_v20, 0.0  ;;  %v472_v26 = vpack.c.bf16 %v464_v21, %v463_v24  ;;  %v657_v21 = vld [vmem:[%s1254_s5] sm:$0x1] }
 0x101   : > { %v471_v25 = vpack.c.bf16 %v462_v23, %v461_v22  ;;  %v667_v22 = vstv %s666_s15 }
 0x103   : > { %896 = vmatprep.mubr.bf16.mxu1 %v471_v25 }
 0x104   : > { %897 = vmatmul.mubr.bf16.gmra.mxu1 %v472_v26 }
 0x1ac   : > { %v886_v28 = vpop.f32.mrf.mxu1 }
 0x1ad   : > { %v587_v31 = vadd.f32 %v886_v28, %v800_v29 }
 0x1ae   : > { %v578_v30 = vpop.f32.mrf.mxu1 }
 0x1af   : > { %v579_v33 = vadd.f32 %v800_v29, %v578_v30  ;;  %v643_v36 = vmax.f32 %v587_v31, 0.0 }
 0x1b0   : > { %v887_v32 = vpop.f32.mrf.mxu1 }
 0x1b1   : > { %v590_v34 = vadd.f32 %v887_v32, %v800_v29  ;;  %v641_v40 = vmax.f32 %v579_v33, 0.0 }
 0x1b2   : > { %v581_v35 = vpop.f32.mrf.mxu1 }
 0x1b3   : > { %v644_v37 = vmax.f32 %v590_v34, 0.0  ;;  %v582_v38 = vadd.f32 %v800_v29, %v581_v35 }
 0x1b4   : > { %v890_v39 = vpop.f32.mrf.mxu1 }
 0x1b5   : > { %v659_v41 = vpack.c.bf16 %v644_v37, %v643_v36  ;;  %v642_v42 = vmax.f32 %v582_v38, 0.0  ;;  %v603_v12 = vadd.f32 %v890_v39, %v800_v29 }
 0x1b6   : > { %v594_v43 = vpop.f32.mrf.mxu1 }
 0x1b7   : > { %v658_v44 = vpack.c.bf16 %v642_v42, %v641_v40  ;;  %v647_v14 = vmax.f32 %v603_v12, 0.0  ;;  %v595_v17 = vadd.f32 %v800_v29, %v594_v43 }
 0x1b8   : > { %v891_v45 = vpop.f32.mrf.mxu1 }
 0x1b9   : > { %v606_v10 = vadd.f32 %v891_v45, %v800_v29  ;;  %v645_v19 = vmax.f32 %v595_v17, 0.0 }
 0x1ba   : > { %v597_v46 = vpop.f32.mrf.mxu1 }
 0x1bb   : > { %v648_v13 = vmax.f32 %v606_v10, 0.0  ;;  %v598_v16 = vadd.f32 %v800_v29, %v597_v46 }
 0x1bc   : > { %v894_v47 = vpop.f32.mrf.mxu1 }
 0x1bd   : > { %v619_v2 = vadd.f32 %v894_v47, %v800_v29  ;;  %v661_v15 = vpack.c.bf16 %v648_v13, %v647_v14  ;;  %v646_v18 = vmax.f32 %v598_v16, 0.0 }
 0x1be   : > { %v610_v48 = vpop.f32.mrf.mxu1 }
 0x1bf   : > { %v651_v4 = vmax.f32 %v619_v2, 0.0  ;;  %v611_v7 = vadd.f32 %v800_v29, %v610_v48  ;;  %v660_v20 = vpack.c.bf16 %v646_v18, %v645_v19 }
 0x1c0   : > { %v895_v49 = vpop.f32.mrf.mxu1 }
 0x1c1   : > { %v622_v0 = vadd.f32 %v895_v49, %v800_v29  ;;  %v649_v9 = vmax.f32 %v611_v7, 0.0 }
 0x1c2   : > { %v613_v50 = vpop.f32.mrf.mxu1 }
 0x1c3   : > { %v652_v3 = vmax.f32 %v622_v0, 0.0  ;;  %v614_v6 = vadd.f32 %v800_v29, %v613_v50 }
 0x1c4   : > { %v898_v51 = vpop.f32.mrf.mxu1 }
 0x1c5   : > { %v635_v53 = vadd.f32 %v898_v51, %v800_v29  ;;  %v663_v5 = vpack.c.bf16 %v652_v3, %v651_v4  ;;  %v650_v8 = vmax.f32 %v614_v6, 0.0 }
 0x1c6   : > { %v626_v52 = vpop.f32.mrf.mxu1 }
 0x1c7   : > { %v655_v57 = vmax.f32 %v635_v53, 0.0  ;;  %v627_v61 = vadd.f32 %v800_v29, %v626_v52  ;;  %v662_v11 = vpack.c.bf16 %v650_v8, %v649_v9 }
 0x1c8   : > { %v899_v54 = vpop.f32.mrf.mxu1 }
 0x1c9   : > { %v638_v55 = vadd.f32 %v899_v54, %v800_v29  ;;  %v653_v63 = vmax.f32 %v627_v61, 0.0 }
 0x1ca   : > { %v629_v56 = vpop.f32.mrf.mxu1 }
 0x1cb   : > { %v656_v58 = vmax.f32 %v638_v55, 0.0  ;;  %v630_v59 = vadd.f32 %v800_v29, %v629_v56 }
 0x1cd   : > { %v665_v60 = vpack.c.bf16 %v656_v58, %v655_v57  ;;  %v654_v62 = vmax.f32 %v630_v59, 0.0 }
 0x1cf   : > { %901 = vmatpush3.bf16.xpose.msra.mxu0 %v665_v60  ;;  %v664_v1 = vpack.c.bf16 %v654_v62, %v653_v63 }
 0x1d0   : > { %902 = vmatprep.subr.bf16.mxu0 %v1037_v27 }
 0x1d7   : > { %903 = vmatpush3.bf16.xpose.msra.mxu0 %v664_v1 }
 0x1d8   : > { %904 = vmatprep.subr.bf16.mxu0 %v1037_v27 }
 0x1df   : > { %905 = vmatpush3.bf16.xpose.msra.mxu0 %v663_v5 }
 0x1e0   : > { %906 = vmatprep.subr.bf16.mxu0 %v1037_v27 }
 0x1e7   : > { %907 = vmatpush3.bf16.xpose.msra.mxu0 %v662_v11 }
 0x1e8   : > { %908 = vmatprep.subr.bf16.mxu0 %v1037_v27 }
 0x1ef   : > { %909 = vmatpush3.bf16.xpose.msra.mxu0 %v661_v15 }
 0x1f0   : > { %910 = vmatprep.subr.bf16.mxu0 %v1037_v27 }
 0x1f7   : > { %911 = vmatpush3.bf16.xpose.msra.mxu0 %v660_v20 }
 0x1f8   : > { %912 = vmatprep.subr.bf16.mxu0 %v1037_v27 }
 0x1ff   : > { %913 = vmatpush3.bf16.xpose.msra.mxu0 %v659_v41 }
 0x200   : > { %914 = vmatprep.subr.bf16.mxu0 %v1037_v27 }
 0x207   : > { %915 = vmatpush3.bf16.xpose.msra.mxu0 %v658_v44 }
 0x20e   : > { %917 = vmatmul.mubr.bf16.vlgmr.msra.gmra.mxu0 %v657_v21 }
 0x2ce   : > { %v702_v23 = vpop.f32.mrf.mxu0 }
 0x2cf   : > { %v703_v24 = vadd.f32 %v702_v23, %v667_v22 }
 0x2d0   : > { %v918_v25 = vpop.f32.mrf.mxu0 }
 0x2d1   : > { %v809_v26 = vmul.f32 -1.442695, %v703_v24 }
 0x2d2   : > { %v705_v28 = vpop.f32.mrf.mxu0 }
 0x2d3   : > { %971 = vpow2.f32 %v809_v26 }
 0x2d4   : > { %v919_v29 = vpop.f32.mrf.mxu0 }
 0x2e0   : > { %v972_v30 = vpop.eup %971 }
 0x2e1   : > { %v711_v27 = vadd.f32 1.0, %v972_v30 }
 0x2e3   : > { %973 = vrcp.f32 %v711_v27 }
 0x2f0   : > { %v974_v31 = vpop.eup %973 }
 0x2f1   : > { %714 = vst [vmem:[%s272_s18] sm:$0x1] %v974_v31 }
 0x2f2   : > { %988 = shalt.err (!%p985_p3)
}
 0x2f3   : > { %s989_s16 = scalar_lea.hbm %s1214_s22, 16  ;;  %s993_s14 = scalar_lea.hbm %s1256_s7, 64 }
 0x2f4   : > { %p990_p4 = scmp.ne.s32.totalorder %s1214_s22, %s989_s16  ;;  %p994_p9 = scmp.lt.s32.totalorder %s1214_s22, %s1256_s7 }
 0x2f5   : > { %p995_p10 = scmp.lt.s32.totalorder %s993_s14, %s989_s16 }
 0x2f6   : > { %p991_p7 = pnand %p990_p4, %p1118_p5 }
 0x2f7   : > { %p996_p11 = por %p995_p10, %p994_p9 }
 0x2f8   : > { %p992_p8 = pneg %p991_p7 }
 0x2fa   : > { %p997_p12 = pnand %p996_p11, %p992_p8 }
 0x2fc   : > { %1000 = shalt.err (!%p997_p12)
}
 0x2fd   : > { %920 = dma.vmem_to_hbm [thread:$0]  (%p1118_p5), %s729_s19, 16, %s1214_s22, %s716_s23  }
 0x2fe PF: > { %p926_p13 = scmp.ge.s32.totalorder %s1035_s29, 2  ;;  %s740_s18 = sand.u32 1, %s1023_s26  }
 0x2ff   : > { %s741_s20 = scalar_lea.sflag [#allocation4], %s740_s18 }
 0x300   : > { %p923_p0 = pnand %p926_p13, %p1122_p6 }
 0x302   : > { %p924_p1 = pneg %p923_p0 }
 0x304   : > { %1018 = dma.done.wait (%p924_p1), %s741_s20, 16  }
 0x305   : > { %1020 = vsyncadd (%p924_p1), %s741_s20, 4294967280  ;;  %p18_p2 = scmp.ge.s32.totalorder %s1106_s8, 6   ;;  %s1259_s26 = smov %s1027_s27 }
 0x306   : > { %s1260_s27 = smov %s1031_s28  ;;  %s1261_s28 = smov %s1116_s11 }
 0x307   : > { %s1262_s29 = smov %s1106_s8  ;;  %20 = sbr.rel (!%p18_p2) target bundleno = 5 (0x5), region = 83 }
 0x30c   :  { %745 = vsyncpa [#allocation4], 1 }
 0x30d   :  { %747 = vsyncpa [#allocation4 + $0x1], 1 }

</bundles_post_ra>
